<compile_context>
chip_gen: v7x
topology: tpu7x:2x2x1
jax: 0.10.0
libtpu: 0.0.40
codegen_flags: <defaults>
</compile_context>

<pallas_src>
import functools

import jax
import jax.numpy as jnp
from jax import lax
from jax.experimental import pallas as pl
from jax.experimental.pallas import tpu as pltpu


def _contrastive_loss_kernel(a_ref, neg_ref, pos_ref, nn_ref, out_ref, acc_ref,
                             *, margin: float, scale: float, n_rows: int,
                             tile_n: int):
    i = pl.program_id(0)

    @pl.when(i == 0)
    def _init():
        acc_ref[0] = jnp.float32(0.0)

    a = a_ref[...].astype(jnp.float32)
    n = neg_ref[...].astype(jnp.float32)
    p = pos_ref[...].astype(jnp.float32)
    nn = nn_ref[...].astype(jnp.float32)

    # Per-row inverse norms via rsqrt (EUP slot) — no element-wise division.
    inv_a = lax.rsqrt(jnp.sum(a * a, axis=-1, keepdims=True))     # (tile_n, 1)
    inv_n = lax.rsqrt(jnp.sum(n * n, axis=-1, keepdims=True))
    inv_p = lax.rsqrt(jnp.sum(p * p, axis=-1, keepdims=True))
    inv_nn = lax.rsqrt(jnp.sum(nn * nn, axis=-1, keepdims=True))

    # positive_loss = ||nn_hat - p_hat||^2 = 2 - 2 * cos(nn, p)
    cos_np = jnp.sum(nn * p, axis=-1, keepdims=True) * inv_nn * inv_p
    pos_loss = 2.0 - 2.0 * cos_np                                  # (tile_n, 1)

    # negative_loss = relu(margin - ||a_hat - n_hat||)^2
    cos_an = jnp.sum(a * n, axis=-1, keepdims=True) * inv_a * inv_n
    dist = jnp.sqrt(jnp.maximum(2.0 - 2.0 * cos_an, 0.0))
    neg_loss = jnp.maximum(jnp.float32(margin) - dist, 0.0) ** 2   # (tile_n, 1)

    # Mask padded rows of a ragged last tile (NaNs in masked rows are dropped
    # by jnp.where).
    row_ids = lax.broadcasted_iota(jnp.int32, (tile_n, 1), 0)
    valid = (i * tile_n + row_ids) < n_rows
    tile_sum = jnp.sum(jnp.where(valid, pos_loss + neg_loss, 0.0))

    acc_ref[0] = acc_ref[0] + tile_sum

    @pl.when(i == pl.num_programs(0) - 1)
    def _finalize():
        # loss = mean(0.5 * cat([pos_loss, neg_loss])) = sum * (0.25 / N)
        out_ref[0, 0] = acc_ref[0] * jnp.float32(scale)


def _pick_tile_n(n_rows: int, d: int, itemsize: int) -> int:
    # 4 inputs x 2 pipeline buffers per tile; keep under a ~16 MiB budget so
    # the pipeline fits the v7x scoped VMEM default (32 MiB) with headroom.
    budget_bytes = 16 * 1024 * 1024
    rows_fit = max(8, budget_bytes // (4 * 2 * max(d, 1) * itemsize))
    tile = min(n_rows, rows_fit, 2048)
    if tile < n_rows:
        tile = max(8, (tile // 8) * 8)  # keep sublane (8) divisibility when tiling
    return tile


def contrastive_loss_with_noise(anchors, negatives, positives, neg_noise,
                                margin: float = 0.2):
    assert anchors.shape == negatives.shape == positives.shape == neg_noise.shape
    assert anchors.ndim == 2
    n_rows, d = anchors.shape
    tile_n = _pick_tile_n(n_rows, d, anchors.dtype.itemsize)
    grid = (pl.cdiv(n_rows, tile_n),)

    kernel = functools.partial(
        _contrastive_loss_kernel,
        margin=float(margin),
        scale=0.25 / float(n_rows),
        n_rows=int(n_rows),
        tile_n=int(tile_n),
    )

    tile_spec = pl.BlockSpec((tile_n, d), lambda i: (i, 0))

    out = pl.pallas_call(
        kernel,
        out_shape=jax.ShapeDtypeStruct((1, 1), jnp.float32),
        grid_spec=pltpu.PrefetchScalarGridSpec(
            num_scalar_prefetch=0,
            grid=grid,
            in_specs=[tile_spec, tile_spec, tile_spec, tile_spec],
            out_specs=pl.BlockSpec(memory_space=pltpu.SMEM),
            scratch_shapes=[pltpu.SMEM((1,), jnp.float32)],
        ),
        compiler_params=pltpu.CompilerParams(
            dimension_semantics=("arbitrary",),
        ),
    )(anchors, negatives, positives, neg_noise)
    return out[0, 0]


def _reference(anchors, negatives, positives, neg_noise, margin=0.2):
    def norm(x):
        return x / jnp.linalg.norm(x, axis=-1, keepdims=True)
    a, n, p, nn = map(norm, (anchors, negatives, positives, neg_noise))
    pos_loss = jnp.sum((nn - p) ** 2, axis=1)
    neg_loss = jnp.maximum(margin - jnp.sqrt(jnp.sum((a - n) ** 2, axis=1)), 0.0) ** 2
    return jnp.mean(0.5 * jnp.concatenate([pos_loss, neg_loss], axis=0))


if __name__ == "__main__":
    key = jax.random.PRNGKey(0)
    k1, k2, k3, k4 = jax.random.split(key, 4)
    N, D = 8, 32  # small synthetic shapes: batch of 8 embeddings, hidden=32
    anchors = jax.random.normal(k1, (N, D), dtype=jnp.float32)
    negatives = jax.random.normal(k2, (N, D), dtype=jnp.float32)
    positives = jax.random.normal(k3, (N, D), dtype=jnp.float32)
    neg_noise = jax.random.normal(k4, (N, D), dtype=jnp.float32)

    loss = contrastive_loss_with_noise(anchors, negatives, positives, neg_noise,
                                       margin=0.2)
    loss = jax.block_until_ready(loss)

    ref = _reference(anchors, negatives, positives, neg_noise, margin=0.2)
    assert jnp.allclose(loss, ref, rtol=2e-5, atol=1e-5), (loss, ref)
    print("KERNEL_OK")
</pallas_src>

<mosaic_0001>
module attributes {stable_mosaic.version = 11 : i64} {
  func.func @_contrastive_loss_kernel(%arg0: i32, %arg1: memref<8x32xf32, #tpu.memory_space<vmem>>, %arg2: memref<8x32xf32, #tpu.memory_space<vmem>>, %arg3: memref<8x32xf32, #tpu.memory_space<vmem>>, %arg4: memref<8x32xf32, #tpu.memory_space<vmem>>, %arg5: memref<1x1xf32, #tpu.memory_space<smem>>, %arg6: memref<1xf32, #tpu.memory_space<smem>>) attributes {dimension_semantics = [#tpu.dimension_semantics<arbitrary>], iteration_bounds = array<i64: 1>, scalar_prefetch = 0 : i64, scratch_operands = 1 : i64, tpu.core_type = #tpu.core_type<tc>, window_params = [{transform_indices = @transform_0, window_bounds = array<i64: 8, 32>}, {transform_indices = @transform_1, window_bounds = array<i64: 8, 32>}, {transform_indices = @transform_2, window_bounds = array<i64: 8, 32>}, {transform_indices = @transform_3, window_bounds = array<i64: 8, 32>}, {transform_indices = @transform_4, window_bounds = array<i64: 1, 1>}]} {
    %c0_i32 = arith.constant 0 : i32
    %0 = arith.cmpi eq, %arg0, %c0_i32 : i32
    %1 = arith.extui %0 : i1 to i32
    %c0_i32_0 = arith.constant 0 : i32
    %2 = arith.cmpi ne, %1, %c0_i32_0 : i32
    scf.if %2 {
      %cst_27 = arith.constant 0.000000e+00 : f32
      %c0_28 = arith.constant 0 : index
      %68 = memref.load %arg6[%c0_28] : memref<1xf32, #tpu.memory_space<smem>>
      memref.store %cst_27, %arg6[%c0_28] : memref<1xf32, #tpu.memory_space<smem>>
    } else {
    }
    %c0 = arith.constant 0 : index
    %c0_1 = arith.constant 0 : index
    %3 = vector.load %arg1[%c0, %c0_1] : memref<8x32xf32, #tpu.memory_space<vmem>>, vector<8x32xf32>
    %c0_2 = arith.constant 0 : index
    %c0_3 = arith.constant 0 : index
    %4 = vector.load %arg2[%c0_2, %c0_3] : memref<8x32xf32, #tpu.memory_space<vmem>>, vector<8x32xf32>
    %c0_4 = arith.constant 0 : index
    %c0_5 = arith.constant 0 : index
    %5 = vector.load %arg3[%c0_4, %c0_5] : memref<8x32xf32, #tpu.memory_space<vmem>>, vector<8x32xf32>
    %c0_6 = arith.constant 0 : index
    %c0_7 = arith.constant 0 : index
    %6 = vector.load %arg4[%c0_6, %c0_7] : memref<8x32xf32, #tpu.memory_space<vmem>>, vector<8x32xf32>
    %7 = arith.mulf %3, %3 : vector<8x32xf32>
    %cst = arith.constant dense<0.000000e+00> : vector<8xf32>
    %8 = vector.multi_reduction <add>, %7, %cst [1] : vector<8x32xf32> to vector<8xf32>
    %9 = vector.shape_cast %8 : vector<8xf32> to vector<8x1xf32>
    %10 = math.rsqrt %9 : vector<8x1xf32>
    %11 = arith.mulf %4, %4 : vector<8x32xf32>
    %cst_8 = arith.constant dense<0.000000e+00> : vector<8xf32>
    %12 = vector.multi_reduction <add>, %11, %cst_8 [1] : vector<8x32xf32> to vector<8xf32>
    %13 = vector.shape_cast %12 : vector<8xf32> to vector<8x1xf32>
    %14 = math.rsqrt %13 : vector<8x1xf32>
    %15 = arith.mulf %5, %5 : vector<8x32xf32>
    %cst_9 = arith.constant dense<0.000000e+00> : vector<8xf32>
    %16 = vector.multi_reduction <add>, %15, %cst_9 [1] : vector<8x32xf32> to vector<8xf32>
    %17 = vector.shape_cast %16 : vector<8xf32> to vector<8x1xf32>
    %18 = math.rsqrt %17 : vector<8x1xf32>
    %19 = arith.mulf %6, %6 : vector<8x32xf32>
    %cst_10 = arith.constant dense<0.000000e+00> : vector<8xf32>
    %20 = vector.multi_reduction <add>, %19, %cst_10 [1] : vector<8x32xf32> to vector<8xf32>
    %21 = vector.shape_cast %20 : vector<8xf32> to vector<8x1xf32>
    %22 = math.rsqrt %21 : vector<8x1xf32>
    %23 = arith.mulf %6, %5 : vector<8x32xf32>
    %cst_11 = arith.constant dense<0.000000e+00> : vector<8xf32>
    %24 = vector.multi_reduction <add>, %23, %cst_11 [1] : vector<8x32xf32> to vector<8xf32>
    %25 = vector.shape_cast %24 : vector<8xf32> to vector<8x1xf32>
    %26 = arith.mulf %25, %22 : vector<8x1xf32>
    %27 = arith.mulf %26, %18 : vector<8x1xf32>
    %cst_12 = arith.constant 2.000000e+00 : f32
    %28 = vector.broadcast %cst_12 : f32 to vector<8x1xf32>
    %29 = arith.mulf %28, %27 : vector<8x1xf32>
    %cst_13 = arith.constant 2.000000e+00 : f32
    %30 = vector.broadcast %cst_13 : f32 to vector<8x1xf32>
    %31 = arith.subf %30, %29 : vector<8x1xf32>
    %32 = arith.mulf %3, %4 : vector<8x32xf32>
    %cst_14 = arith.constant dense<0.000000e+00> : vector<8xf32>
    %33 = vector.multi_reduction <add>, %32, %cst_14 [1] : vector<8x32xf32> to vector<8xf32>
    %34 = vector.shape_cast %33 : vector<8xf32> to vector<8x1xf32>
    %35 = arith.mulf %34, %10 : vector<8x1xf32>
    %36 = arith.mulf %35, %14 : vector<8x1xf32>
    %cst_15 = arith.constant 2.000000e+00 : f32
    %37 = vector.broadcast %cst_15 : f32 to vector<8x1xf32>
    %38 = arith.mulf %37, %36 : vector<8x1xf32>
    %cst_16 = arith.constant 2.000000e+00 : f32
    %39 = vector.broadcast %cst_16 : f32 to vector<8x1xf32>
    %40 = arith.subf %39, %38 : vector<8x1xf32>
    %cst_17 = arith.constant 0.000000e+00 : f32
    %41 = vector.broadcast %cst_17 : f32 to vector<8x1xf32>
    %42 = arith.maximumf %40, %41 : vector<8x1xf32>
    %43 = math.sqrt %42 : vector<8x1xf32>
    %cst_18 = arith.constant 2.000000e-01 : f32
    %44 = vector.broadcast %cst_18 : f32 to vector<8x1xf32>
    %45 = arith.subf %44, %43 : vector<8x1xf32>
    %cst_19 = arith.constant 0.000000e+00 : f32
    %46 = vector.broadcast %cst_19 : f32 to vector<8x1xf32>
    %47 = arith.maximumf %45, %46 : vector<8x1xf32>
    %48 = arith.mulf %47, %47 : vector<8x1xf32>
    %49 = tpu.iota {dimensions = array<i32: 0>} : vector<8x1xi32>
    %c8_i32 = arith.constant 8 : i32
    %50 = arith.muli %arg0, %c8_i32 : i32
    %51 = vector.broadcast %50 : i32 to vector<8x1xi32>
    %52 = arith.addi %51, %49 : vector<8x1xi32>
    %c8_i32_20 = arith.constant 8 : i32
    %53 = vector.broadcast %c8_i32_20 : i32 to vector<8x1xi32>
    %54 = arith.cmpi slt, %52, %53 : vector<8x1xi32>
    %55 = arith.addf %31, %48 : vector<8x1xf32>
    %cst_21 = arith.constant 0.000000e+00 : f32
    %56 = vector.broadcast %cst_21 : f32 to vector<8x1xf32>
    %57 = arith.select %54, %55, %56 : vector<8x1xi1>, vector<8x1xf32>
    %58 = vector.shape_cast %57 : vector<8x1xf32> to vector<1x8x1xf32>
    %cst_22 = arith.constant dense<0.000000e+00> : vector<1xf32>
    %59 = vector.multi_reduction <add>, %58, %cst_22 [1, 2] : vector<1x8x1xf32> to vector<1xf32>
    %60 = vector.shape_cast %59 : vector<1xf32> to vector<1x1x1xf32>
    %61 = vector.extract %60[0, 0, 0] : f32 from vector<1x1x1xf32>
    %c0_23 = arith.constant 0 : index
    %62 = memref.load %arg6[%c0_23] : memref<1xf32, #tpu.memory_space<smem>>
    %63 = arith.addf %62, %61 : f32
    %c0_24 = arith.constant 0 : index
    %64 = memref.load %arg6[%c0_24] : memref<1xf32, #tpu.memory_space<smem>>
    memref.store %63, %arg6[%c0_24] : memref<1xf32, #tpu.memory_space<smem>>
    %c0_i32_25 = arith.constant 0 : i32
    %65 = arith.cmpi eq, %arg0, %c0_i32_25 : i32
    %66 = arith.extui %65 : i1 to i32
    %c0_i32_26 = arith.constant 0 : i32
    %67 = arith.cmpi ne, %66, %c0_i32_26 : i32
    scf.if %67 {
      %c0_27 = arith.constant 0 : index
      %68 = memref.load %arg6[%c0_27] : memref<1xf32, #tpu.memory_space<smem>>
      %cst_28 = arith.constant 3.125000e-02 : f32
      %69 = arith.mulf %68, %cst_28 : f32
      %c0_29 = arith.constant 0 : index
      %c0_30 = arith.constant 0 : index
      %70 = memref.load %arg5[%c0_29, %c0_30] : memref<1x1xf32, #tpu.memory_space<smem>>
      memref.store %69, %arg5[%c0_29, %c0_30] : memref<1x1xf32, #tpu.memory_space<smem>>
    } else {
    }
    return
  }
  func.func @transform_0(%arg0: i32) -> (i32, i32) {
    %c0_i32 = arith.constant 0 : i32
    %c0_i32_0 = arith.constant 0 : i32
    return %arg0, %c0_i32 : i32, i32
  }
  func.func @transform_1(%arg0: i32) -> (i32, i32) {
    %c0_i32 = arith.constant 0 : i32
    %c0_i32_0 = arith.constant 0 : i32
    return %arg0, %c0_i32 : i32, i32
  }
  func.func @transform_2(%arg0: i32) -> (i32, i32) {
    %c0_i32 = arith.constant 0 : i32
    %c0_i32_0 = arith.constant 0 : i32
    return %arg0, %c0_i32 : i32, i32
  }
  func.func @transform_3(%arg0: i32) -> (i32, i32) {
    %c0_i32 = arith.constant 0 : i32
    %c0_i32_0 = arith.constant 0 : i32
    return %arg0, %c0_i32 : i32, i32
  }
  func.func @transform_4(%arg0: i32) -> (i32, i32) {
    %c0_i32 = arith.constant 0 : i32
    %c0_i32_0 = arith.constant 0 : i32
    %c0_i32_1 = arith.constant 0 : i32
    return %c0_i32, %c0_i32_0 : i32, i32
  }
}

</mosaic_0001>

<bundles_post_ra>
// kernel: tpu_custom_call.1
= control target key start
LH: loop header
LB: loop body
LE: loop exit
PB: predicated region body
PF: predicated region fallthrough
CT: control target
= control target key end

     0   :  { %9 = vsyncpa [#allocation4], 0  ;;  %s340_s0 = inlined_call_operand.hbm [shape: f32[8,32], index: 0, kind: input, shape index: {}]   ;;  %s341_s1 = inlined_call_operand.hbm [shape: f32[8,32], index: 1, kind: input, shape index: {}]   ;;  %s342_s2 = inlined_call_operand.hbm [shape: f32[8,32], index: 2, kind: input, shape index: {}]   ;;  %s343_s3 = inlined_call_operand.vmem [shape: f32[8,32], index: 3, kind: input, shape index: {}]   ;;  %s344_s4 = inlined_call_operand.hbm [shape: f32[1,1], index: 4, kind: output, shape index: {}]  }
   0x1   :  { %10 = vsyncpa [#allocation7], 0 }
   0x2   :  { %11 = vsyncpa [#allocation5], 0  ;;  %s254_s15 = smov [#allocation6]   ;;  %s255_s17 = smov [#allocation3]  }
   0x3   :  { %s28_s16 = sshll.u32 %s254_s15, 4  ;;  %s18_s18 = sshll.u32 %s255_s17, 4  ;;  %s29_s16 = int_to_ptr.vmem [resolvable:$true] %s28_s16  ;;  %s19_s18 = int_to_ptr.vmem [resolvable:$true] %s18_s18 }
   0x4   :  { %s172_s21 = scalar_lea.hbm %s341_s1, 128 }
   0x5   :  { %p173_p0 = scmp.ne.s32.totalorder %s341_s1, %s172_s21  ;;  %p176_p1 = scmp.lt.u32.totalorder %s172_s21, %s341_s1 }
   0x7   :  { %p178_p2 = pnand %p176_p1, %p173_p0 }
   0x9   :  { %181 = shalt.err (!%p178_p2)
}
   0xa   :  { %s182_s26 = scalar_lea.vmem %s29_s16, 128  ;;  %p187_p4 = scmp.lt.s32.totalorder %s29_s16, %s29_s16 }
   0xb   :  { %p183_p3 = scmp.ne.s32.totalorder %s29_s16, %s182_s26  ;;  %p188_p5 = scmp.lt.s32.totalorder %s182_s26, %s182_s26 }
   0xd   :  { %p189_p6 = por %p188_p5, %p187_p4 }
   0xf   :  { %p190_p7 = pnand %p189_p6, %p183_p3 }
  0x11   :  { %193 = shalt.err (!%p190_p7)
}
  0x12   :  { %31 = dma.hbm_to_vmem [thread:$0]  %s341_s1, 128, %s29_s16, [#allocation7]  }
  0x13   :  { %s194_s5 = scalar_lea.hbm %s340_s0, 128 }
  0x14   :  { %p195_p8 = scmp.ne.s32.totalorder %s340_s0, %s194_s5  ;;  %p198_p9 = scmp.lt.u32.totalorder %s194_s5, %s340_s0 }
  0x16   :  { %p200_p10 = pnand %p198_p9, %p195_p8 }
  0x18   :  { %203 = shalt.err (!%p200_p10)
}
  0x19   :  { %s204_s10 = scalar_lea.vmem %s19_s18, 128  ;;  %p209_p12 = scmp.lt.s32.totalorder %s19_s18, %s19_s18 }
  0x1a   :  { %p205_p11 = scmp.ne.s32.totalorder %s19_s18, %s204_s10  ;;  %p210_p13 = scmp.lt.s32.totalorder %s204_s10, %s204_s10 }
  0x1c   :  { %p211_p0 = por %p210_p13, %p209_p12 }
  0x1e   :  { %p212_p1 = pnand %p211_p0, %p205_p11 }
  0x20   :  { %215 = shalt.err (!%p212_p1)
}
  0x21   :  { %21 = dma.hbm_to_vmem [thread:$0]  %s340_s0, 128, %s19_s18, [#allocation4]  }
  0x22   :  { %s256_s12 = smov [#allocation8]   ;;  %s216_s16 = scalar_lea.hbm %s342_s2, 128 }
  0x23   :  { %s38_s13 = sshll.u32 %s256_s12, 4  ;;  %p217_p2 = scmp.ne.s32.totalorder %s342_s2, %s216_s16  ;;  %s39_s13 = int_to_ptr.vmem [resolvable:$true] %s38_s13 }
  0x24   :  { %p220_p3 = scmp.lt.u32.totalorder %s216_s16, %s342_s2 }
  0x26   :  { %p222_p4 = pnand %p220_p3, %p217_p2 }
  0x28   :  { %225 = shalt.err (!%p222_p4)
}
  0x29   :  { %s226_s22 = scalar_lea.vmem %s39_s13, 128  ;;  %p231_p6 = scmp.lt.s32.totalorder %s39_s13, %s39_s13 }
  0x2a   :  { %p227_p5 = scmp.ne.s32.totalorder %s39_s13, %s226_s22  ;;  %p232_p7 = scmp.lt.s32.totalorder %s226_s22, %s226_s22 }
  0x2c   :  { %p233_p8 = por %p232_p7, %p231_p6 }
  0x2e   :  { %p234_p9 = pnand %p233_p8, %p227_p5 }
  0x30   :  { %237 = shalt.err (!%p234_p9)
}
  0x31   :  { %41 = dma.hbm_to_vmem [thread:$0]  %s342_s2, 128, %s39_s13, [#allocation7]  }
  0x32   :  { %248 = dma.done.wait [#allocation4], 128  }
  0x33   :  { %249 = vsyncadd [#allocation4], 4294967168 }
  0x34   :  { %250 = dma.done.wait [#allocation7], 256  }
  0x35   :  { %251 = vsyncadd [#allocation7], 4294967040  ;;  %v59_v0 = vld [vmem:[#allocation3] sm:$0xff]  ;;  %vm64_vm0 = vcmask 261120   ;;  %v60_v1 = vld [vmem:[#allocation6] sm:$0xff]  ;;  %vm119_vm3 = vcmask 7168  }
  0x36   :  { %v62_v2 = vld [vmem:[%s343_s3] sm:$0xff]  ;;  %v63_v3 = vmul.f32 %v59_v0, %v59_v0  ;;  %v69_v4 = vmul.f32 %v60_v1, %v60_v1  ;;  %v92_v5 = vmul.f32 %v60_v1, %v59_v0  ;;  %v61_v7 = vld [vmem:[#allocation8] sm:$0xff]  ;;  %s238_s27 = scalar_lea.hbm %s344_s4, 16 }
  0x37   :  { %v79_v6 = vmul.f32 %v62_v2, %v62_v2  ;;  %v74_v12 = vmul.f32 %v61_v7, %v61_v7  ;;  %v84_v13 = vmul.f32 %v62_v2, %v61_v7  ;;  %p239_p10 = scmp.ne.s32.totalorder %s344_s4, %s238_s27  ;;  %p242_p11 = scmp.lt.u32.totalorder %s238_s27, %s344_s4 }
  0x38   :  { %v65_v8 = vsel %vm64_vm0, %v63_v3, 0.0  ;;  %v93_v9 = vsel %vm64_vm0, %v92_v5, 0.0  ;;  %v70_v10 = vsel %vm64_vm0, %v69_v4, 0.0 }
  0x39   :  { %66 = vadd.xlane.f32.xlu0 %v65_v8  ;;  %94 = vadd.xlane.f32.xlu1 %v93_v9  ;;  %v80_v11 = vsel %vm64_vm0, %v79_v6, 0.0  ;;  %v75_v14 = vsel %vm64_vm0, %v74_v12, 0.0  ;;  %v85_v15 = vsel %vm64_vm0, %v84_v13, 0.0  ;;  %p244_p12 = pnand %p242_p11, %p239_p10 }
  0x3d   :  { %71 = vadd.xlane.f32.xlu0 %v70_v10  ;;  %81 = vadd.xlane.f32.xlu1 %v80_v11 }
  0x41   :  { %76 = vadd.xlane.f32.xlu0 %v75_v14  ;;  %86 = vadd.xlane.f32.xlu1 %v85_v15 }
  0xc6   :  { %v67_v16 = vpop.xlane.xlu0 %66  ;;  %v95_v18 = vpop.xlane.xlu1 %94 }
  0xc7   :  { %162 = vrsqrt.f32 %v67_v16 }
  0xca   :  { %v72_v17 = vpop.xlane.xlu0 %71  ;;  %v82_v20 = vpop.xlane.xlu1 %81 }
  0xcb   :  { %164 = vrsqrt.f32 %v72_v17 }
  0xcc   :  { %166 = vrsqrt.f32 %v82_v20 }
  0xce   :  { %v77_v24 = vpop.xlane.xlu0 %76  ;;  %v87_v29 = vpop.xlane.xlu1 %86 }
  0xcf   :  { %168 = vrsqrt.f32 %v77_v24 }
  0xd1   :  { %v163_v19 = vpop.eup %162 }
  0xd2   :  { %v96_v21 = vmul.f32 %v163_v19, %v95_v18 }
  0xd5   :  { %v165_v22 = vpop.eup %164 }
  0xd6   :  { %v97_v23 = vmul.f32 %v165_v22, %v96_v21  ;;  %v167_v28 = vpop.eup %166 }
  0xd7   :  { %v88_v30 = vmul.f32 %v167_v28, %v87_v29 }
  0xd8   :  { %v98_v25 = vmul.f32 2.0, %v97_v23 }
  0xd9   :  { %v169_v31 = vpop.eup %168 }
  0xda   :  { %v99_v26 = vsub.f32 2.0, %v98_v25  ;;  %v89_v32 = vmul.f32 %v169_v31, %v88_v30 }
  0xdc   :  { %v100_v27 = vmax.f32 %v99_v26, 0.0  ;;  %v90_v36 = vmul.f32 2.0, %v89_v32 }
  0xde   :  { %170 = vrsqrt.f32 %v100_v27  ;;  %vm103_vm1 = vcmp.eq.f32.partialorder %v100_v27, inf  ;;  %v106_v35 = vand.u32 2147483648, %v100_v27  ;;  %vm105_vm2 = vcmp.eq.f32.partialorder %v100_v27, 0.0 }
  0xdf   :  { %v91_v40 = vsub.f32 2.0, %v90_v36 }
  0xe8   :  { %v171_v33 = vpop.eup %170 }
  0xe9   :  { %v102_v34 = vmul.f32 %v171_v33, %v100_v27 }
  0xeb   :  { %v104_v37 = vsel %vm103_vm1, %v100_v27, %v102_v34 }
  0xec   :  { %v107_v38 = vsel %vm105_vm2, %v106_v35, %v104_v37 }
  0xed   :  { %v108_v39 = vsub.f32 0.2, %v107_v38 }
  0xef   :  { %v109_v41 = vmax.f32 %v108_v39, 0.0 }
  0xf1   :  { %v110_v42 = vmul.f32 %v109_v41, %v109_v41 }
  0xf3   :  { %v117_v43 = vadd.f32 %v110_v42, %v91_v40 }
  0xf5   :  { %v120_v44 = vsel %vm119_vm3, %v117_v43, 0.0 }
  0xf6   :  { %121 = vadd.xlane.f32.xlu0 %v120_v44 }
 0x183   :  { %v122_v45 = vpop.xlane.xlu0 %121 }
 0x184   :  { %v123_v46 = vrot.slane %v122_v45, 4 }
 0x186   :  { %v124_v47 = vadd.f32 %v123_v46, %v122_v45 }
 0x188   :  { %v125_v48 = vrot.slane %v124_v47, 2 }
 0x18a   :  { %v126_v49 = vadd.f32 %v125_v48, %v124_v47 }
 0x18c   :  { %v127_v50 = vrot.slane %v126_v49, 1 }
 0x18e   :  { %v128_v51 = vadd.f32 %v127_v50, %v126_v49 }
 0x190   :  { %156 = vpush %v128_v51 }
 0x1c1   :  { %s157_s2 = spop %156 }
 0x1c2   :  { %s138_s3 = smul.f32 0.03125, %s157_s2 }
 0x1c4   :  { %140 = sst [smem:[#allocation9]] %s138_s3 }
 0x1c5   :  { %247 = shalt.err (!%p244_p12)
}
 0x1c6   :  { %s257_s6 = smov [#allocation9]  }
 0x1c7   :  { %148 = dma.smem_to_hbm %s257_s6, 16, %s344_s4, [#allocation5]  }
 0x1c8   :  { %252 = dma.done.wait [#allocation5], 16  }
 0x1c9   :  { %253 = vsyncadd [#allocation5], 4294967280 }
 0x1ca   :  { %152 = sfence }
 0x1cb   :  { %153 = vsyncpa [#allocation4], 1 }
 0x1cc   :  { %154 = vsyncpa [#allocation7], 1 }
 0x1cd   :  { %155 = vsyncpa [#allocation5], 1 }

</bundles_post_ra>
